<compile_context>
chip_gen: v6e
topology: v6e:2x2x1
jax: 0.10.0
libtpu: 0.0.40
codegen_flags: <defaults>
</compile_context>

<pallas_src>
import jax
import jax.numpy as jnp
from jax.experimental import pallas as pl
from jax.experimental.pallas import tpu as pltpu

HIDDEN = 5   # linear1 out_features
OUT = 1      # linear2 out_features


def _mlp_head_kernel(x_ref, w1_ref, b1_ref, w2_ref, b2_ref, o_ref):
    # x_ref : (tb, F)     w1_ref: (F, 5)    b1_ref: (1, 5)
    # w2_ref: (1, 5)      b2_ref: (1, 1)    o_ref : (1, 1, tb)  (lane-dense)
    x = x_ref[...]

    # linear1 on the MXU with f32 accumulation, then ReLU on the VPU.
    h = jnp.dot(x, w1_ref[...], preferred_element_type=jnp.float32) + b1_ref[...]
    h = jnp.maximum(h, 0.0)

    # linear2 (K=5, N=1) on the VPU/XLU: broadcast-mul by the w2 row and
    # reduce over the 5 live lanes. Avoids a second MXU round-trip per block.
    y = jnp.sum(h * w2_ref[...], axis=-1, keepdims=True) + b2_ref[...]   # (tb, 1)
    y = 0.5 * (1.0 + jnp.tanh(y))

    # Lane-dense store: (tb, 1) -> (1, tb) transpose (XLU has slack) -> (1,1,tb).
    o_ref[...] = y.T.reshape(o_ref.shape).astype(o_ref.dtype)


def _pick_batch_tile(B, F):
    """Pick the batch tile tb (multiple of 8).

    Big enough to amortize the ~0.35us per-grid-step overhead, small enough
    that the double-buffered f32 x tile (2 * tb * F * 4B) stays <= ~16 MiB so
    it fits comfortably on every generation (v7x has only 64 MiB VMEM).
    """
    x_tile_budget = 16 * 1024 * 1024
    tb = x_tile_budget // (2 * 4 * max(F, 1))
    tb = max(8, min(1024, (tb // 8) * 8))

    b_pad8 = -(-B // 8) * 8          # batch rounded up to the sublane (8)
    tb = min(tb, b_pad8)

    # v7x has 2 TensorCores; "parallel" shards the grid across them. Make sure
    # we have >= 2 grid steps whenever the batch allows it.
    if b_pad8 > 8 and b_pad8 <= tb:
        tb = max(8, (-(-(b_pad8 // 2) // 8)) * 8)
    return tb


@jax.jit
def delta_velocity_head(embedding, w1, b1, w2, b2):
    """embedding: (B, F) float32. w1: (F, 5), b1: (5,)/(1,5), w2: (5,1)/(5,),
    b2: (1,)/(1,1). Returns torch.squeeze-equivalent output of shape (B,)
    (scalar if B == 1)."""
    B, F = embedding.shape
    b1 = jnp.reshape(b1, (1, HIDDEN))
    w2_row = jnp.reshape(w2, (1, HIDDEN))     # (5, 1) -> (1, 5): same data order
    b2 = jnp.reshape(b2, (1, 1))

    tb = _pick_batch_tile(B, F)
    n_tiles = pl.cdiv(B, tb)
    b_pad = n_tiles * tb
    x = embedding
    if b_pad != B:
        x = jnp.pad(x, ((0, b_pad - B), (0, 0)))   # padded rows sliced off below

    out = pl.pallas_call(
        _mlp_head_kernel,
        out_shape=jax.ShapeDtypeStruct((n_tiles, 1, tb), jnp.float32),
        grid_spec=pltpu.PrefetchScalarGridSpec(
            num_scalar_prefetch=0,
            grid=(n_tiles,),
            in_specs=[
                pl.BlockSpec((tb, F), lambda i: (i, 0)),        # x: streamed over batch
                pl.BlockSpec((F, HIDDEN), lambda i: (0, 0)),    # W1: VMEM-resident
                pl.BlockSpec((1, HIDDEN), lambda i: (0, 0)),    # b1
                pl.BlockSpec((1, HIDDEN), lambda i: (0, 0)),    # w2 row
                pl.BlockSpec((1, OUT), lambda i: (0, 0)),       # b2
            ],
            out_specs=pl.BlockSpec((1, 1, tb), lambda i: (i, 0, 0)),  # lane-dense
        ),
        compiler_params=pltpu.CompilerParams(
            dimension_semantics=("parallel",),
            # Raise scoped VMEM (v5e default is only 16 MiB) but stay well under
            # v7x's 64 MiB physical VMEM.
            vmem_limit_bytes=48 * 1024 * 1024,
        ),
    )(x, w1, b1, w2_row, b2)

    # (n_tiles, 1, tb) -> (B,), dropping padded rows; torch.squeeze semantics.
    return jnp.squeeze(out.reshape(-1)[:B])


def init_params(key, in_features):
    """Deterministic init mimicking torch.nn.Linear defaults."""
    k1, k2, k3, k4 = jax.random.split(key, 4)
    lim1 = 1.0 / jnp.sqrt(in_features)
    lim2 = 1.0 / jnp.sqrt(HIDDEN)
    # stored as (in, out) so the kernel computes x @ W
    w1 = jax.random.uniform(k1, (in_features, HIDDEN), jnp.float32, -lim1, lim1)
    b1 = jax.random.uniform(k2, (1, HIDDEN), jnp.float32, -lim1, lim1)
    w2 = jax.random.uniform(k3, (HIDDEN, OUT), jnp.float32, -lim2, lim2)
    b2 = jax.random.uniform(k4, (1, OUT), jnp.float32, -lim2, lim2)
    return w1, b1, w2, b2


def reference(embedding, w1, b1, w2, b2):
    h = jnp.maximum(embedding @ w1 + b1.reshape(1, HIDDEN), 0.0)
    y = h @ w2.reshape(HIDDEN, OUT) + b2.reshape(1, OUT)
    return jnp.squeeze(0.5 * (1.0 + jnp.tanh(y)))


if __name__ == "__main__":
    key = jax.random.PRNGKey(0)
    k_x, k_p = jax.random.split(key)

    # Small shapes; batch=12 deliberately not a multiple of the tile to
    # exercise the padding / multi-tile (megacore) path.
    batch, in_features = 12, 32
    embedding = jax.random.normal(k_x, (batch, in_features), jnp.float32)
    w1, b1, w2, b2 = init_params(k_p, in_features)

    out = jax.block_until_ready(delta_velocity_head(embedding, w1, b1, w2, b2))
    ref = reference(embedding, w1, b1, w2, b2)

    assert out.shape == (batch,), out.shape
    assert jnp.allclose(out, ref, atol=1e-5, rtol=1e-5), (out, ref)

    print("KERNEL_OK")
</pallas_src>

<mosaic_0001>
module attributes {stable_mosaic.version = 11 : i64} {
  func.func @_mlp_head_kernel(%arg0: i32, %arg1: memref<8x32xf32, #tpu.memory_space<vmem>>, %arg2: memref<32x5xf32, #tpu.memory_space<vmem>>, %arg3: memref<1x5xf32, #tpu.memory_space<vmem>>, %arg4: memref<1x5xf32, #tpu.memory_space<vmem>>, %arg5: memref<1x1xf32, #tpu.memory_space<vmem>>, %arg6: memref<1x1x8xf32, #tpu.memory_space<vmem>>) attributes {dimension_semantics = [#tpu.dimension_semantics<parallel>], iteration_bounds = array<i64: 2>, scalar_prefetch = 0 : i64, scratch_operands = 0 : i64, tpu.core_type = #tpu.core_type<tc>, window_params = [{transform_indices = @transform_0, window_bounds = array<i64: 8, 32>}, {pipeline_mode = #tpu.pipeline_mode<synchronous>, transform_indices = @transform_1, window_bounds = array<i64: 32, 5>}, {pipeline_mode = #tpu.pipeline_mode<synchronous>, transform_indices = @transform_2, window_bounds = array<i64: 1, 5>}, {pipeline_mode = #tpu.pipeline_mode<synchronous>, transform_indices = @transform_3, window_bounds = array<i64: 1, 5>}, {pipeline_mode = #tpu.pipeline_mode<synchronous>, transform_indices = @transform_4, window_bounds = array<i64: 1, 1>}, {transform_indices = @transform_5, window_bounds = array<i64: 1, 1, 8>}]} {
    %c0 = arith.constant 0 : index
    %c0_0 = arith.constant 0 : index
    %0 = vector.load %arg1[%c0, %c0_0] : memref<8x32xf32, #tpu.memory_space<vmem>>, vector<8x32xf32>
    %c0_1 = arith.constant 0 : index
    %c0_2 = arith.constant 0 : index
    %1 = vector.load %arg2[%c0_1, %c0_2] : memref<32x5xf32, #tpu.memory_space<vmem>>, vector<32x5xf32>
    %cst = arith.constant dense<0.000000e+00> : vector<8x5xf32>
    %2 = tpu.matmul %0, %1, %cst {dimension_numbers = #tpu.dot_dimension_numbers<[1], [0], [0], [1], [0, 0, 1, 1], [], []>} : vector<8x32xf32>, vector<32x5xf32>, vector<8x5xf32> -> vector<8x5xf32>
    %c0_3 = arith.constant 0 : index
    %c0_4 = arith.constant 0 : index
    %3 = vector.load %arg3[%c0_3, %c0_4] : memref<1x5xf32, #tpu.memory_space<vmem>>, vector<1x5xf32>
    %4 = vector.broadcast %3 : vector<1x5xf32> to vector<8x5xf32>
    %5 = arith.addf %2, %4 : vector<8x5xf32>
    %cst_5 = arith.constant 0.000000e+00 : f32
    %6 = vector.broadcast %cst_5 : f32 to vector<8x5xf32>
    %7 = arith.maximumf %5, %6 : vector<8x5xf32>
    %c0_6 = arith.constant 0 : index
    %c0_7 = arith.constant 0 : index
    %8 = vector.load %arg4[%c0_6, %c0_7] : memref<1x5xf32, #tpu.memory_space<vmem>>, vector<1x5xf32>
    %9 = vector.broadcast %8 : vector<1x5xf32> to vector<8x5xf32>
    %10 = arith.mulf %7, %9 : vector<8x5xf32>
    %cst_8 = arith.constant dense<0.000000e+00> : vector<8xf32>
    %11 = vector.multi_reduction <add>, %10, %cst_8 [1] : vector<8x5xf32> to vector<8xf32>
    %12 = vector.shape_cast %11 : vector<8xf32> to vector<8x1xf32>
    %c0_9 = arith.constant 0 : index
    %c0_10 = arith.constant 0 : index
    %13 = vector.load %arg5[%c0_9, %c0_10] : memref<1x1xf32, #tpu.memory_space<vmem>>, vector<1x1xf32>
    %14 = vector.broadcast %13 : vector<1x1xf32> to vector<8x1xf32>
    %15 = arith.addf %12, %14 : vector<8x1xf32>
    %16 = math.tanh %15 : vector<8x1xf32>
    %cst_11 = arith.constant 1.000000e+00 : f32
    %17 = vector.broadcast %cst_11 : f32 to vector<8x1xf32>
    %18 = arith.addf %17, %16 : vector<8x1xf32>
    %cst_12 = arith.constant 5.000000e-01 : f32
    %19 = vector.broadcast %cst_12 : f32 to vector<8x1xf32>
    %20 = arith.mulf %19, %18 : vector<8x1xf32>
    %21 = tpu.transpose %20, [1, 0] : vector<8x1xf32> -> vector<1x8xf32>
    %22 = vector.shape_cast %21 : vector<1x8xf32> to vector<1x1x8xf32>
    %c0_13 = arith.constant 0 : index
    %c0_14 = arith.constant 0 : index
    %c0_15 = arith.constant 0 : index
    %23 = vector.load %arg6[%c0_13, %c0_14, %c0_15] : memref<1x1x8xf32, #tpu.memory_space<vmem>>, vector<1x1x8xf32>
    tpu.vector_store %arg6[%c0_13, %c0_14, %c0_15], %22 {strides = array<i32>} : memref<1x1x8xf32, #tpu.memory_space<vmem>>, vector<1x1x8xf32>,
    return
  }
  func.func @transform_0(%arg0: i32) -> (i32, i32) {
    %c0_i32 = arith.constant 0 : i32
    %c0_i32_0 = arith.constant 0 : i32
    return %arg0, %c0_i32 : i32, i32
  }
  func.func @transform_1(%arg0: i32) -> (i32, i32) {
    %c0_i32 = arith.constant 0 : i32
    %c0_i32_0 = arith.constant 0 : i32
    %c0_i32_1 = arith.constant 0 : i32
    return %c0_i32, %c0_i32_0 : i32, i32
  }
  func.func @transform_2(%arg0: i32) -> (i32, i32) {
    %c0_i32 = arith.constant 0 : i32
    %c0_i32_0 = arith.constant 0 : i32
    %c0_i32_1 = arith.constant 0 : i32
    return %c0_i32, %c0_i32_0 : i32, i32
  }
  func.func @transform_3(%arg0: i32) -> (i32, i32) {
    %c0_i32 = arith.constant 0 : i32
    %c0_i32_0 = arith.constant 0 : i32
    %c0_i32_1 = arith.constant 0 : i32
    return %c0_i32, %c0_i32_0 : i32, i32
  }
  func.func @transform_4(%arg0: i32) -> (i32, i32) {
    %c0_i32 = arith.constant 0 : i32
    %c0_i32_0 = arith.constant 0 : i32
    %c0_i32_1 = arith.constant 0 : i32
    return %c0_i32, %c0_i32_0 : i32, i32
  }
  func.func @transform_5(%arg0: i32) -> (i32, i32, i32) {
    %c0_i32 = arith.constant 0 : i32
    %c0_i32_0 = arith.constant 0 : i32
    %c0_i32_1 = arith.constant 0 : i32
    return %arg0, %c0_i32, %c0_i32_0 : i32, i32, i32
  }
}

</mosaic_0001>

<bundles_post_ra>
// kernel: delta_velocity_head.1
= control target key start
LH: loop header
LB: loop body
LE: loop exit
PB: predicated region body
PF: predicated region fallthrough
CT: control target
= control target key end

     0   :  { %s494_s20 = smov 0   ;;  %s533_s0 = inlined_call_operand.vmem [shape: f32[16,32], index: 0, kind: input, shape index: {}]   ;;  %s534_s1 = inlined_call_operand.vmem [shape: f32[32,5], index: 1, kind: input, shape index: {}]   ;;  %s535_s2 = inlined_call_operand.vmem [shape: f32[1,5], index: 2, kind: input, shape index: {}]   ;;  %s536_s3 = inlined_call_operand.vmem [shape: f32[1,5], index: 3, kind: input, shape index: {}]   ;;  %s537_s4 = inlined_call_operand.<no memory space> [shape: f32[1,1], index: 4, kind: input, shape index: {}]   ;;  %s538_s5 = inlined_call_operand.vmem [shape: f32[2,1,8], index: 5, kind: output, shape index: {}]  }
   0x1   :  { %v10_v0 = vstv %s537_s4 }
   0x2   :  { %11 = vst [vmem:[#allocation2] sm:$0x1] %v10_v0 }
   0x3 LB: > { %s411_s21 = sadd.s32 4294967295, %s457_s20   ;;  %p415_p0 = scmp.ge.s32.totalorder %s457_s20, 1  ;;  %s457_s20 = sphi %s494_s20, %s17_s20  }
   0x4   : > { %p188_p1 = scmp.lt.s32.totalorder %s457_s20, 3 }
   0x6   : > { %p189_p2 = pnand %p415_p0, %p188_p1 }
   0x7   : > { %p213_p3 = scmp.lt.s32.totalorder (!%p189_p2), %s411_s21, 1 }
   0x8   : > { %192 = sbr.rel (%p189_p2) target bundleno = 506 (0x1fa), region = 40 }
   0xd   : > { %v224_v1 = vld [vmem:[%s534_s1 + $0x18] sm:$0xff]  ;;  %v459_v2 = vmov 0.0   ;;  %v223_v3 = vld [vmem:[%s534_s1 + $0x10] sm:$0xff]  ;;  %vm460_vm0 = vmmov 0   ;;  %s540_s21 = smov (!%p213_p3, %s411_s21), 1  ;;  %v222_v4 = vld [vmem:[%s534_s1 + $0x8] sm:$0xff] }
   0xe   : > { %428 = vmatprep.subr.mxu0 %v459_v2  ;;  %436 = vmatprep.mubr.msk.f32.mxu0 %vm460_vm0, %v459_v2  ;;  %s416_s27 = sshll.u32 %s540_s21, 3  ;;  %v221_v5 = vld [vmem:[%s534_s1] sm:$0xff]  ;;  %vm232_vm1 = vcmask 261120   ;;  %vm315_vm2 = vcmask 39936   ;;  %s219_s14 = scalar_lea.vmem %s538_s5, %s540_s21  ;;  %vm362_vm3 = vcmask 57344  }
   0xf   : > { %429 = vmatpush3.msra.mxu0 %v224_v1  ;;  %s216_s7 = scalar_lea.vmem %s533_s0, %s416_s27  ;;  %v417_v7 = vld [vmem:[%s535_s2] ss:$0 sm:$0xff] }
  0x10   : > { %430 = vmatprep.subr.mxu0 %v459_v2  ;;  %v220_v6 = vld [vmem:[%s216_s7] sm:$0xff] }
  0x11   : > { %431 = vmatpush3.msra.mxu0 %v223_v3  ;;  %v419_v11 = vld [vmem:[%s536_s3] ss:$0 sm:$0xff] }
  0x12   : > { %432 = vmatprep.subr.mxu0 %v459_v2  ;;  %v420_v15 = vld [vmem:[#allocation2] ss:$0 sm:$0xff] }
  0x13   : > { %433 = vmatpush3.msra.mxu0 %v222_v4 }
  0x14   : > { %434 = vmatprep.subr.mxu0 %v459_v2 }
  0x15   : > { %435 = vmatpush3.msra.mxu0 %v221_v5 }
  0x16   : > { %437 = vmatmul.mubr.msk.f32.vlgmr.msra.gmra.mxu0 %vm232_vm1, %v220_v6 }
  0xd6   : > { %v302_v8 = vpop.f32.mrf.mxu0 }
  0xd7   : > { %v303_v9 = vadd.f32 %v417_v7, %v302_v8 }
  0xd8   : > { %v438_v10 = vpop.f32.mrf.mxu0 }
  0xd9   : > { %v306_v12 = vmax.f32 %v303_v9, 0.0 }
  0xdb   : > { %v314_v13 = vmul.f32 %v419_v11, %v306_v12 }
  0xdd   : > { %v316_v14 = vsel %vm315_vm2, %v314_v13, 0.0 }
  0xde   : > { %317 = vadd.xlane.f32.xlu0 %v316_v14 }
 0x167   : > { %v318_v16 = vpop.xlane.xlu0 %317 }
 0x168   : > { %v326_v17 = vadd.f32 %v420_v15, %v318_v16 }
 0x16a   : > { %449 = vtanh.f32 %v326_v17 }
 0x177   : > { %v450_v18 = vpop.eup %449 }
 0x178   : > { %v328_v19 = vadd.f32 1.0, %v450_v18 }
 0x17a   : > { %v329_v20 = vmul.f32 0.5, %v328_v19 }
 0x17c   : > { %330 = vxpose.xlu0.b32.start.end [1/1] (short) (narrow) %v329_v20, 8 }
 0x1f8   : > { %v346_v21 = vpop.trf.xlu0 }
 0x1f9   : > { %363 = vst.msk [vmem:[%s219_s14] sm:$0x1] %vm362_vm3, %v346_v21 }
 0x1fa PF: > { %s17_s20 = sadd.s32 1, %s457_s20  }
 0x1fb   : > { %p14_p4 = scmp.ge.s32.totalorder %s17_s20, 4  }
 0x1fd   :  { %16 = sbr.rel (!%p14_p4) target bundleno = 3 (0x3), region = 70 }

</bundles_post_ra>
